<compile_context>
chip_gen: v5e
topology: v5e:2x2
jax: 0.10.0
libtpu: 0.0.40
codegen_flags: <defaults>
</compile_context>

<pallas_src>
import functools

import jax
import jax.numpy as jnp
from jax.experimental import pallas as pl
from jax.experimental.pallas import tpu as pltpu


def _blend_kernel(scal_ref, colors_ref, out_ref, *, sigma, gamma, znear, zfar):
    eps = 1e-10
    # scal_ref: (3, K, TP) = stacked [dists, zbuf, mask]; leading-axis int index is cheap.
    dists = scal_ref[0]                                            # (K, TP)
    zbuf = scal_ref[1]                                             # (K, TP)
    mask = scal_ref[2]                                             # (K, TP)

    prob_map = jax.nn.sigmoid(dists * (-1.0 / sigma)) * mask       # (K, TP)
    # alpha = prod_K(1 - prob_map) is computed in the reference but never used in the output.
    z_inv = (zfar - zbuf) * (1.0 / (zfar - znear)) * mask          # (K, TP)
    z_inv_max = jnp.max(z_inv, axis=0, keepdims=True)              # (1, TP)  cross-sublane
    w_num = prob_map * jnp.exp((z_inv - z_inv_max) * (1.0 / gamma))  # (K, TP) (opacity == 1)
    delta = jnp.maximum(jnp.exp((eps - z_inv_max) * (1.0 / gamma)), eps)
    denom = jnp.sum(w_num, axis=0, keepdims=True) + delta          # (1, TP)
    inv_denom = pl.reciprocal(denom)                               # 1 recip vs C divides

    # colors: (C, K, TP) -> weighted sum over K (sublane axis) -> (C, TP)
    colors = colors_ref[...].astype(jnp.float32)
    weighted = jnp.sum(w_num[None, :, :] * colors, axis=1)         # (C, TP)
    out_ref[...] = (weighted * inv_denom).astype(out_ref.dtype)


def softmax_texture_blend_pallas(colors, pix_to_face, dists, zbuf,
                                 *, sigma, gamma, znear=1.0, zfar=100.0, tile_p=8192):
    """colors: (N,H,W,K,C) f32; pix_to_face: (N,H,W,K) int; dists/zbuf: (N,H,W,K) f32."""
    N, H, W, K, C = colors.shape
    P = N * H * W

    # ---- pick a large lane tile (multiple of 128), but keep >= 2 grid steps for megacore.
    p_pad = ((P + 127) // 128) * 128
    tp = min(int(tile_p), p_pad)
    tp = (tp // 128) * 128
    if p_pad // tp < 2 and p_pad >= 256:
        tp = max(128, ((p_pad // 2) // 128) * 128)
    p_pad = pl.cdiv(p_pad, tp) * tp

    # ---- glue: one stacked scalar stream + one colors stream (fewer DMAs, fewer transposes).
    # TODO(synk): these repacks still re-stream the fragment buffers through HBM once; for a
    # fully fused path the rasterizer should emit K-major buffers upstream.
    mask = (pix_to_face >= 0).astype(jnp.float32)
    scal = jnp.stack([dists.reshape(P, K),
                      zbuf.reshape(P, K),
                      mask.reshape(P, K)], axis=0)                   # (3, P, K)
    scal = jnp.transpose(scal, (0, 2, 1))                            # (3, K, P)
    col = jnp.transpose(colors.reshape(P, K, C).astype(jnp.float32), (2, 1, 0))  # (C, K, P)

    if p_pad != P:
        scal = jnp.pad(scal, ((0, 0), (0, 0), (0, p_pad - P)))
        col = jnp.pad(col, ((0, 0), (0, 0), (0, p_pad - P)))

    kernel = functools.partial(_blend_kernel, sigma=float(sigma), gamma=float(gamma),
                               znear=float(znear), zfar=float(zfar))

    out = pl.pallas_call(
        kernel,
        out_shape=jax.ShapeDtypeStruct((C, p_pad), jnp.float32),
        grid_spec=pltpu.PrefetchScalarGridSpec(
            num_scalar_prefetch=0,
            grid=(p_pad // tp,),
            in_specs=[
                pl.BlockSpec((3, K, tp), lambda i: (0, 0, i)),   # stacked dists/zbuf/mask
                pl.BlockSpec((C, K, tp), lambda i: (0, 0, i)),   # colors, (C,K,P) layout
            ],
            out_specs=pl.BlockSpec((C, tp), lambda i: (0, i)),
        ),
        compiler_params=pltpu.CompilerParams(dimension_semantics=("parallel",)),
    )(scal, col)

    # (C, P_pad) -> (N, H, W, C)
    out = out[:, :P]
    return jnp.transpose(out, (1, 0)).reshape(N, H, W, C).astype(colors.dtype)


def soft_texture_shader_forward(texels, pix_to_face, dists, zbuf,
                                *, sigma=1e-4, gamma=1e-4, znear=1.0, zfar=100.0):
    """Mirrors SoftTextureShader.forward.

    texels: (N, H, W, K, no_basis)  -- output of meshes.sample_textures(fragments)
    pix_to_face/dists/zbuf: (N, H, W, K) fragment buffers.
    """
    N, H, W, K = pix_to_face.shape
    # texture_shading: colors = texels.reshape(N,H,W,K,-1); opacity = ones(N,H,W,K)
    # opacity is identically 1.0 here, so it is folded into the kernel (no extra HBM stream).
    colors = texels.reshape(N, H, W, K, -1).astype(jnp.float32)
    # TODO(synk): mesh rasterization / sample_textures / interpolate_face_attributes are
    # pytorch3d geometry ops; their outputs (texels, fragments) are taken as kernel inputs.
    return softmax_texture_blend_pallas(colors, pix_to_face, dists, zbuf,
                                        sigma=sigma, gamma=gamma, znear=znear, zfar=zfar)


def _reference_blend(colors, pix_to_face, dists, zbuf, opacity,
                     *, sigma, gamma, znear=1.0, zfar=100.0):
    eps = 1e-10
    mask = (pix_to_face >= 0).astype(jnp.float32)
    prob_map = jax.nn.sigmoid(-dists / sigma) * mask
    z_inv = (zfar - zbuf) / (zfar - znear) * mask
    z_inv_max = jnp.max(z_inv, axis=-1, keepdims=True)
    w_num = prob_map * jnp.exp((z_inv - z_inv_max) / gamma) * opacity
    delta = jnp.maximum(jnp.exp((eps - z_inv_max) / gamma), eps)
    denom = jnp.sum(w_num, axis=-1, keepdims=True) + delta
    weighted = jnp.sum(w_num[..., None] * colors, axis=-2)
    return weighted / denom


if __name__ == "__main__":
    key = jax.random.PRNGKey(0)
    N, H, W, K, C = 2, 16, 16, 8, 3
    sigma, gamma = 1e-4, 1e-4   # BlendParams defaults

    k1, k2, k3, k4 = jax.random.split(key, 4)
    texels = jax.random.uniform(k1, (N, H, W, K, C), dtype=jnp.float32)
    # small signed distances so sigmoid(-d/sigma) is not degenerate
    dists = jax.random.normal(k2, (N, H, W, K), dtype=jnp.float32) * sigma
    zbuf = jax.random.uniform(k3, (N, H, W, K), dtype=jnp.float32) * 10.0 + 1.0
    # some faces invalid (-1), rest valid indices
    pix_to_face = jax.random.randint(k4, (N, H, W, K), minval=-1, maxval=64)

    out = soft_texture_shader_forward(texels, pix_to_face, dists, zbuf,
                                      sigma=sigma, gamma=gamma)
    out = jax.block_until_ready(out)
    assert out.shape == (N, H, W, C), out.shape

    ref = _reference_blend(texels.reshape(N, H, W, K, C).astype(jnp.float32),
                           pix_to_face, dists, zbuf,
                           jnp.ones((N, H, W, K), jnp.float32),
                           sigma=sigma, gamma=gamma)
    assert jnp.allclose(out, ref, atol=1e-5, rtol=1e-5)

    print("KERNEL_OK")
</pallas_src>

<mosaic_0001>
module attributes {stable_mosaic.version = 11 : i64} {
  func.func @_blend_kernel(%arg0: i32, %arg1: memref<3x8x256xf32, #tpu.memory_space<vmem>>, %arg2: memref<3x8x256xf32, #tpu.memory_space<vmem>>, %arg3: memref<3x256xf32, #tpu.memory_space<vmem>>) attributes {dimension_semantics = [#tpu.dimension_semantics<parallel>], iteration_bounds = array<i64: 2>, scalar_prefetch = 0 : i64, scratch_operands = 0 : i64, tpu.core_type = #tpu.core_type<tc>, window_params = [{transform_indices = @transform_0, window_bounds = array<i64: 3, 8, 256>}, {transform_indices = @transform_1, window_bounds = array<i64: 3, 8, 256>}, {transform_indices = @transform_2, window_bounds = array<i64: 3, 256>}]} {
    %c0 = arith.constant 0 : index
    %c0_0 = arith.constant 0 : index
    %c0_1 = arith.constant 0 : index
    %0 = vector.load %arg1[%c0, %c0_0, %c0_1] : memref<3x8x256xf32, #tpu.memory_space<vmem>>, vector<1x8x256xf32>
    %1 = vector.shape_cast %0 : vector<1x8x256xf32> to vector<8x256xf32>
    %c1 = arith.constant 1 : index
    %c0_2 = arith.constant 0 : index
    %c0_3 = arith.constant 0 : index
    %2 = vector.load %arg1[%c1, %c0_2, %c0_3] : memref<3x8x256xf32, #tpu.memory_space<vmem>>, vector<1x8x256xf32>
    %3 = vector.shape_cast %2 : vector<1x8x256xf32> to vector<8x256xf32>
    %c2 = arith.constant 2 : index
    %c0_4 = arith.constant 0 : index
    %c0_5 = arith.constant 0 : index
    %4 = vector.load %arg1[%c2, %c0_4, %c0_5] : memref<3x8x256xf32, #tpu.memory_space<vmem>>, vector<1x8x256xf32>
    %5 = vector.shape_cast %4 : vector<1x8x256xf32> to vector<8x256xf32>
    %cst = arith.constant -1.000000e+04 : f32
    %6 = vector.broadcast %cst : f32 to vector<8x256xf32>
    %7 = arith.mulf %1, %6 : vector<8x256xf32>
    %8 = arith.negf %7 : vector<8x256xf32>
    %9 = math.exp %8 : vector<8x256xf32>
    %cst_6 = arith.constant 1.000000e+00 : f32
    %10 = vector.broadcast %cst_6 : f32 to vector<8x256xf32>
    %11 = arith.addf %10, %9 : vector<8x256xf32>
    %12 = arith.divf %10, %11 : vector<8x256xf32>
    %13 = arith.mulf %12, %5 : vector<8x256xf32>
    %cst_7 = arith.constant 1.000000e+02 : f32
    %14 = vector.broadcast %cst_7 : f32 to vector<8x256xf32>
    %15 = arith.subf %14, %3 : vector<8x256xf32>
    %cst_8 = arith.constant 0.0101010101 : f32
    %16 = vector.broadcast %cst_8 : f32 to vector<8x256xf32>
    %17 = arith.mulf %15, %16 : vector<8x256xf32>
    %18 = arith.mulf %17, %5 : vector<8x256xf32>
    %cst_9 = arith.constant dense<0xFF800000> : vector<256xf32>
    %19 = vector.multi_reduction <maximumf>, %18, %cst_9 [0] : vector<8x256xf32> to vector<256xf32>
    %20 = vector.shape_cast %19 : vector<256xf32> to vector<1x256xf32>
    %21 = vector.broadcast %20 : vector<1x256xf32> to vector<8x256xf32>
    %22 = arith.subf %18, %21 : vector<8x256xf32>
    %cst_10 = arith.constant 1.000000e+04 : f32
    %23 = vector.broadcast %cst_10 : f32 to vector<8x256xf32>
    %24 = arith.mulf %22, %23 : vector<8x256xf32>
    %25 = math.exp %24 : vector<8x256xf32>
    %26 = arith.mulf %13, %25 : vector<8x256xf32>
    %cst_11 = arith.constant 1.000000e-10 : f32
    %27 = vector.broadcast %cst_11 : f32 to vector<1x256xf32>
    %28 = arith.subf %27, %20 : vector<1x256xf32>
    %cst_12 = arith.constant 1.000000e+04 : f32
    %29 = vector.broadcast %cst_12 : f32 to vector<1x256xf32>
    %30 = arith.mulf %28, %29 : vector<1x256xf32>
    %31 = math.exp %30 : vector<1x256xf32>
    %cst_13 = arith.constant 1.000000e-10 : f32
    %32 = vector.broadcast %cst_13 : f32 to vector<1x256xf32>
    %33 = arith.maximumf %31, %32 : vector<1x256xf32>
    %cst_14 = arith.constant dense<0.000000e+00> : vector<256xf32>
    %34 = vector.multi_reduction <add>, %26, %cst_14 [0] : vector<8x256xf32> to vector<256xf32>
    %35 = vector.shape_cast %34 : vector<256xf32> to vector<1x256xf32>
    %36 = arith.addf %35, %33 : vector<1x256xf32>
    %37 = tpu.reciprocal %36 : vector<1x256xf32> -> vector<1x256xf32>
    %c0_15 = arith.constant 0 : index
    %c0_16 = arith.constant 0 : index
    %c0_17 = arith.constant 0 : index
    %38 = vector.load %arg2[%c0_15, %c0_16, %c0_17] : memref<3x8x256xf32, #tpu.memory_space<vmem>>, vector<3x8x256xf32>
    %39 = vector.shape_cast %26 : vector<8x256xf32> to vector<1x8x256xf32>
    %40 = vector.broadcast %39 : vector<1x8x256xf32> to vector<3x8x256xf32>
    %41 = arith.mulf %40, %38 : vector<3x8x256xf32>
    %cst_18 = arith.constant dense<0.000000e+00> : vector<3x256xf32>
    %42 = vector.multi_reduction <add>, %41, %cst_18 [1] : vector<3x8x256xf32> to vector<3x256xf32>
    %43 = vector.broadcast %37 : vector<1x256xf32> to vector<3x256xf32>
    %44 = arith.mulf %42, %43 : vector<3x256xf32>
    %c0_19 = arith.constant 0 : index
    %c0_20 = arith.constant 0 : index
    %45 = vector.load %arg3[%c0_19, %c0_20] : memref<3x256xf32, #tpu.memory_space<vmem>>, vector<3x256xf32>
    tpu.vector_store %arg3[%c0_19, %c0_20], %44 {strides = array<i32>} : memref<3x256xf32, #tpu.memory_space<vmem>>, vector<3x256xf32>,
    return
  }
  func.func @transform_0(%arg0: i32) -> (i32, i32, i32) {
    %c0_i32 = arith.constant 0 : i32
    %c0_i32_0 = arith.constant 0 : i32
    %c0_i32_1 = arith.constant 0 : i32
    return %c0_i32, %c0_i32_0, %arg0 : i32, i32, i32
  }
  func.func @transform_1(%arg0: i32) -> (i32, i32, i32) {
    %c0_i32 = arith.constant 0 : i32
    %c0_i32_0 = arith.constant 0 : i32
    %c0_i32_1 = arith.constant 0 : i32
    return %c0_i32, %c0_i32_0, %arg0 : i32, i32, i32
  }
  func.func @transform_2(%arg0: i32) -> (i32, i32) {
    %c0_i32 = arith.constant 0 : i32
    %c0_i32_0 = arith.constant 0 : i32
    return %c0_i32, %arg0 : i32, i32
  }
}

</mosaic_0001>

<bundles_post_ra>
// kernel: tpu_custom_call.1
= control target key start
LH: loop header
LB: loop body
LE: loop exit
PB: predicated region body
PF: predicated region fallthrough
CT: control target
= control target key end

     0   :  { %s973_s0 = inlined_call_operand.hbm [shape: f32[3,8,512], index: 0, kind: input, shape index: {}]   ;;  %s974_s1 = inlined_call_operand.hbm [shape: f32[3,8,512], index: 1, kind: input, shape index: {}]   ;;  %s975_s2 = inlined_call_operand.hbm [shape: f32[3,512], index: 2, kind: output, shape index: {}]  }
   0x1   :  { %976 = sst [smem:[#allocation11_spill]] %s973_s0 }
   0x2   :  { %7 = vsyncpa [#allocation3], 0 }
   0x3   :  { %9 = vsyncpa [#allocation3 + $0x1], 0 }
   0x4   :  { %10 = vsyncpa [#allocation6], 0 }
   0x5   :  { %12 = vsyncpa [#allocation6 + $0x1], 0 }
   0x6   :  { %13 = vsyncpa [#allocation4], 0 }
   0x7   :  { %15 = vsyncpa [#allocation4 + $0x1], 0  ;;  %s778_s9 = smov 0   ;;  %s780_s10 = smov 0  }
   0x8   :  { %s782_s11 = smov 0   ;;  %s784_s12 = smov 0  }
   0x9 LB: > { %s799_s13 = sadd.s32 4294967295, %s758_s12   ;;  %s528_s14 = sadd.s32 4294967294, %s758_s12   ;;  %s758_s12 = sphi %s784_s12, %s990_s12   ;;  %s754_s11 = sphi %s782_s11, %s989_s11   ;;  %s750_s10 = sphi %s780_s10, %s988_s10   ;;  %s746_s9 = sphi %s778_s9, %s987_s9  }
   0xa   : > { %s803_s15 = sadd.s32 1, %s758_s12   ;;  %s28_s16 = sadd.s32 1, %s754_s11 }
   0xb   : > { %s25_s17 = ssub.s32 %s758_s12, %s803_s15  ;;  %p35_p0 = scmp.ne.s32.totalorder %s754_s11, %s750_s10 }
   0xc   : > { %p26_p1 = scmp.eq.s32.totalorder %s25_s17, 0  ;;  %p36_p2 = scmp.eq.s32.totalorder %s758_s12, 0 }
   0xd   : > { %p41_p3 = scmp.ne.s32.totalorder %s750_s10, %s746_s9  ;;  %p42_p4 = scmp.eq.s32.totalorder %s799_s13, 0 }
   0xe   : > { %s815_s18 = scalar_select %p26_p1, %s754_s11, %s28_s16  }
   0xf   : > { %p37_p5 = por %p36_p2, %p35_p0  ;;  %p817_p6 = por %p42_p4, %p41_p3 }
  0x10   : > { %p91_p7 = scmp.eq.s32.totalorder %s799_s13, 1  ;;  %p97_p8 = scmp.eq.s32.totalorder %s528_s14, 1 }
  0x11   : > { %p530_p9 = scmp.ge.s32.totalorder %s758_s12, 2  ;;  %p571_p10 = scmp.lt.s32.totalorder %s758_s12, 2 }
  0x12   : > { %p824_p11 = por %p91_p7, %p35_p0  ;;  %p828_p12 = por %p97_p8, %p41_p3 }
  0x13   : > { %s833_s22 = sand.u32 1, %s754_s11   ;;  %s548_s23 = sshll.u32 %s758_s12, 4 }
  0x14   : > { %s551_s24 = smul.u32 48, %s833_s22  ;;  %s980_s0 = sld [smem:[#allocation11_spill]] }
  0x15   : > { %p842_p13 = pnand %p571_p10, %p37_p5  ;;  %p535_p0 = scmp.ge.s32.totalorder %s758_s12, 1 }
  0x16   : > { %s121_s30 = scalar_lea.vmem [#allocation2], %s551_s24  ;;  %s118_s4 = scalar_lea.sflag [#allocation3], %s833_s22 }
  0x17   : > { %s129_s3 = sshll.u32 %s121_s30, 4  ;;  %p632_p2 = pneg %p842_p13  ;;  %s130_s3 = int_to_ptr.vmem [resolvable:$true] %s129_s3 }
  0x1a   : > { %s126_s27 = scalar_lea.hbm %s980_s0, %s548_s23  ;;  %s635_s14 = scalar_lea.hbm %s980_s0, 96 }
  0x1b   : > { %s127_s29 = sshll.u32 %s126_s27, 4  ;;  %s128_s29 = int_to_ptr.hbm [resolvable:$true] %s127_s29 }
  0x1c   : > { %s628_s5 = sshra.s32 %s128_s29, 4  ;;  %s629_s5 = int_to_ptr.hbm [resolvable:$true] %s628_s5 }
  0x1d   : > { %s630_s6 = scalar_lea.hbm %s629_s5, 48  ;;  %p636_p5 = scmp.lt.s32.totalorder %s629_s5, %s980_s0 }
  0x1e   : > { %p631_p1 = scmp.ne.s32.totalorder %s629_s5, %s630_s6  ;;  %p637_p7 = scmp.lt.s32.totalorder %s635_s14, %s630_s6 }
  0x20   : > { %p633_p3 = pnand %p632_p2, %p631_p1  ;;  %p638_p8 = por %p637_p7, %p636_p5 }
  0x22   : > { %p634_p4 = pneg %p633_p3 }
  0x24   : > { %p639_p10 = pnand %p638_p8, %p634_p4 }
  0x26   : > { %642 = shalt.err (!%p639_p10)
}
  0x27   : > { %s760_s25 = smov 512   ;;  %s761_s26 = smov 256  }
  0x28   : > { %s762_s27 = smov 16   ;;  %p159_p1 = scmp.lt.s32.totalorder %s758_s12, 3 }
  0x29   : > { %563 = dma.hbm_to_vmem [thread:$0]  (!%p842_p13), %s128_s29, 768, %s130_s3, %s118_s4, %s760_s25, %s761_s26, %s762_s27  }
  0x2a   : > { %s148_s6 = scalar_lea.hbm %s974_s1, %s548_s23  ;;  %p872_p3 = pnand %p535_p0, %p159_p1 }
  0x2b   : > { %s149_s8 = sshll.u32 %s148_s6, 4  ;;  %s143_s14 = scalar_lea.vmem [#allocation5], %s551_s24  ;;  %s150_s8 = int_to_ptr.hbm [resolvable:$true] %s149_s8 }
  0x2c   : > { %s151_s16 = sshll.u32 %s143_s14, 4  ;;  %s140_s17 = scalar_lea.sflag [#allocation6], %s833_s22  ;;  %s152_s16 = int_to_ptr.vmem [resolvable:$true] %s151_s16 }
  0x2d   : > { %s658_s0 = sshra.s32 %s150_s8, 4  ;;  %s665_s4 = scalar_lea.hbm %s974_s1, 96  ;;  %s659_s0 = int_to_ptr.hbm [resolvable:$true] %s658_s0 }
  0x2e   : > { %s660_s29 = scalar_lea.hbm %s659_s0, 48  ;;  %p666_p0 = scmp.lt.s32.totalorder %s659_s0, %s974_s1 }
  0x2f   : > { %p661_p4 = scmp.ne.s32.totalorder %s659_s0, %s660_s29  ;;  %p667_p8 = scmp.lt.s32.totalorder %s665_s4, %s660_s29 }
  0x31   : > { %p663_p5 = pnand %p661_p4, %p632_p2  ;;  %p668_p10 = por %p667_p8, %p666_p0 }
  0x33   : > { %p664_p7 = pneg %p663_p5 }
  0x35   : > { %p669_p1 = pnand %p668_p10, %p664_p7 }
  0x37   : > { %672 = shalt.err (!%p669_p1)
}
  0x38   : > { %566 = dma.hbm_to_vmem [thread:$0]  (!%p842_p13), %s150_s8, 768, %s152_s16, %s140_s17, %s760_s25, %s761_s26, %s762_s27  }
  0x39   : > { %163 = sbr.rel (%p872_p3) target bundleno = 146 (0x92), region = 28  ;;  %s894_s22 = sand.u32 (!%p872_p3), 1, %s750_s10  }
  0x3a   : > { %s553_s24 = smul.u32 (!%p872_p3), 48, %s894_s22  ;;  %s166_s6 = scalar_lea.sflag (!%p872_p3), [#allocation3], %s894_s22 }
  0x3c   : > { %s169_s0 = scalar_lea.vmem (!%p872_p3), [#allocation2], %s553_s24 }
  0x3e   : > { %733 = dma.done.wait (%p817_p6), %s166_s6, 768  }
  0x3f   : > { %735 = vsyncadd (%p817_p6), %s166_s6, 4294966528  ;;  %s176_s28 = scalar_lea.sflag [#allocation6], %s894_s22  ;;  %s903_s25 = scalar_lea.vmem [#allocation5], %s553_s24 }
  0x40   : > { %737 = dma.done.wait (%p817_p6), %s176_s28, 768  }
  0x41   : > { %739 = vsyncadd (%p817_p6), %s176_s28, 4294966528  ;;  %v209_v0 = vld [vmem:[%s169_s0] sm:$0xff]  ;;  %v210_v1 = vld [vmem:[%s169_s0 + $0x8] sm:$0xff]  ;;  %s536_s19 = sshll.u32 %s894_s22, 3  ;;  %s550_s26 = sshll.u32 %s799_s13, 3 }
  0x42   : > { %v537_v2 = vld [vmem:[%s169_s0 + $0x10] sm:$0xff]  ;;  %v538_v3 = vld [vmem:[%s169_s0 + $0x18] sm:$0xff]  ;;  %v541_v4 = vmul.f32 10000.0, %v209_v0  ;;  %v542_v5 = vmul.f32 10000.0, %v210_v1  ;;  %v909_v7 = vld [vmem:[%s169_s0 + $0x20] sm:$0xff]  ;;  %s430_s8 = scalar_lea.hbm %s975_s2, %s550_s26  ;;  %s205_s14 = scalar_lea.vmem [#allocation7], %s536_s19 }
  0x43   : > { %v259_v6 = vsub.f32 100.0, %v537_v2  ;;  %v911_v8 = vld [vmem:[%s169_s0 + $0x28] sm:$0xff]  ;;  %v260_v9 = vsub.f32 100.0, %v538_v3  ;;  %s432_s13 = sshll.u32 %s205_s14, 4  ;;  %s434_s16 = sshll.u32 %s430_s8, 4  ;;  %s433_s13 = int_to_ptr.vmem [resolvable:$true] %s432_s13  ;;  %s435_s16 = int_to_ptr.hbm [resolvable:$true] %s434_s16 }
  0x44   : > { %v221_v10 = vmul.f32 1.442695, %v541_v4  ;;  %v223_v11 = vmul.f32 1.442695, %v542_v5  ;;  %v339_v5 = vld [vmem:[%s903_s25] sm:$0xff]  ;;  %s419_s17 = scalar_lea.sflag [#allocation4], %s894_s22 }
  0x45   : > { %v261_v12 = vmul.f32 0.01010101, %v259_v6  ;;  %v262_v13 = vmul.f32 0.01010101, %v260_v9  ;;  %v341_v6 = vld [vmem:[%s903_s25 + $0x10] sm:$0xff]  ;;  %s702_s29 = sshra.s32 %s435_s16, 4  ;;  %s703_s29 = int_to_ptr.hbm [resolvable:$true] %s702_s29 }
  0x46   : > { %608 = vpow2.f32 %v221_v10  ;;  %v340_v10 = vld [vmem:[%s903_s25 + $0x8] sm:$0xff]  ;;  %s704_s23 = scalar_lea.hbm %s703_s29, 8  ;;  %s708_s30 = scalar_lea.hbm %s975_s2, 16 }
  0x47   : > { %v263_v14 = vmul.f32 %v909_v7, %v261_v12  ;;  %610 = vpow2.f32 %v223_v11  ;;  %v264_v15 = vmul.f32 %v911_v8, %v262_v13  ;;  %v343_v11 = vld [vmem:[%s903_s25 + $0x20] sm:$0xff]  ;;  %p705_p6 = scmp.ne.s32.totalorder %s703_s29, %s704_s23  ;;  %p709_p3 = scmp.lt.s32.totalorder %s703_s29, %s975_s2 }
  0x48   : > { %p710_p4 = scmp.lt.s32.totalorder %s708_s30, %s704_s23 }
  0x49   : > { %v265_v16 = vrot.slane %v263_v14, 4  ;;  %v271_v17 = vrot.slane %v264_v15, 4  ;;  %p706_p13 = pnand %p705_p6, %p824_p11 }
  0x4a   : > { %p711_p5 = por %p710_p4, %p709_p3 }
  0x4b   : > { %v266_v18 = vmax.f32 %v263_v14, %v265_v16  ;;  %v272_v19 = vmax.f32 %v264_v15, %v271_v17  ;;  %p707_p2 = pneg %p706_p13 }
  0x4c   : > { %v609_v20 = vpop.eup %608 }
  0x4d   : > { %v267_v21 = vrot.slane %v266_v18, 2  ;;  %v611_v22 = vpop.eup %610  ;;  %v225_v23 = vadd.f32 1.0, %v609_v20  ;;  %v273_v24 = vrot.slane %v272_v19, 2  ;;  %p712_p7 = pnand %p711_p5, %p707_p2 }
  0x4e   : > { %v226_v25 = vadd.f32 1.0, %v611_v22 }
  0x4f   : > { %v268_v26 = vmax.f32 %v266_v18, %v267_v21  ;;  %612 = vrcp.f32 %v225_v23  ;;  %v274_v28 = vmax.f32 %v272_v19, %v273_v24  ;;  %vm232_vm0 = vweird.f32 %v225_v23 }
  0x50   : > { %614 = vrcp.f32 %v226_v25  ;;  %v236_v32 = vand.u32 2147483647, %v225_v23  ;;  %v238_v37 = vand.u32 2147483648, %v225_v23  ;;  %vm247_vm1 = vweird.f32 %v226_v25 }
  0x51   : > { %v269_v27 = vrot.slane %v268_v26, 1  ;;  %v275_v30 = vrot.slane %v274_v28, 1  ;;  %v251_v40 = vand.u32 2147483647, %v226_v25  ;;  %v253_v44 = vand.u32 2147483648, %v226_v25 }
  0x52   : > { %v239_v52 = vor.u32 1.1754944e-38, %v238_v37  ;;  %vm237_vm5 = vcmp.eq.f32.partialorder %v236_v32, 8.507059e+37 }
  0x53   : > { %v270_v29 = vmax.f32 %v268_v26, %v269_v27  ;;  %v276_v33 = vmax.f32 %v274_v28, %v275_v30  ;;  %v254_v56 = vor.u32 1.1754944e-38, %v253_v44  ;;  %vm252_vm7 = vcmp.eq.f32.partialorder %v251_v40, 8.507059e+37 }
  0x55   : > { %v613_v31 = vpop.eup %612  ;;  %v277_v34 = vsub.f32 %v263_v14, %v270_v29  ;;  %v287_v38 = vsub.f32 1e-10, %v270_v29  ;;  %v278_v41 = vsub.f32 %v264_v15, %v276_v33  ;;  %v288_v45 = vsub.f32 1e-10, %v276_v33  ;;  %v342_v14 = vld [vmem:[%s903_s25 + $0x18] sm:$0xff]  ;;  %v344_v15 = vld [vmem:[%s903_s25 + $0x28] sm:$0xff] }
  0x56   : > { %v615_v35 = vpop.eup %614  ;;  %v228_v36 = vmul.f32 %v613_v31, %v225_v23  ;;  %vm233_vm2 = vweird.f32 %v613_v31 }
  0x57   : > { %v243_v39 = vmul.f32 %v615_v35, %v226_v25  ;;  %v279_v42 = vmul.f32 10000.0, %v277_v34  ;;  %vm248_vm3 = vweird.f32 %v615_v35  ;;  %v280_v47 = vmul.f32 10000.0, %v278_v41  ;;  %vm916_vm4 = vmor %vm232_vm0, %vm233_vm2 }
  0x58   : > { %v229_v43 = vsub.f32 1.0, %v228_v36  ;;  %v289_v50 = vmul.f32 10000.0, %v287_v38  ;;  %vm249_vm6 = vmor %vm247_vm1, %vm248_vm3  ;;  %v290_v57 = vmul.f32 10000.0, %v288_v45  ;;  %vm402_vm0 = vcmask 1043456  }
  0x59   : > { %v244_v46 = vsub.f32 1.0, %v243_v39  ;;  %v281_v48 = vmul.f32 1.442695, %v279_v42  ;;  %v283_v54 = vmul.f32 1.442695, %v280_v47  ;;  %vm407_vm1 = vcmask 1041409  }
  0x5a   : > { %v230_v49 = vmul.f32 %v613_v31, %v229_v43  ;;  %v291_v60 = vmul.f32 1.442695, %v289_v50  ;;  %v293_v1 = vmul.f32 1.442695, %v290_v57  ;;  %vm409_vm2 = vcmask 1045509  }
  0x5b   : > { %v245_v53 = vmul.f32 %v615_v35, %v244_v46  ;;  %616 = vpow2.f32 %v281_v48  ;;  %vm412_vm3 = vcmask 1042434  }
  0x5c   : > { %v231_v55 = vadd.f32 %v613_v31, %v230_v49  ;;  %618 = vpow2.f32 %v283_v54 }
  0x5d   : > { %v246_v58 = vadd.f32 %v615_v35, %v245_v53  ;;  %620 = vpow2.f32 %v291_v60 }
  0x5e   : > { %v235_v59 = vsel %vm916_vm4, %v613_v31, %v231_v55  ;;  %622 = vpow2.f32 %v293_v1  ;;  %vm414_vm4 = vcmask 1046534  }
  0x5f   : > { %v240_v61 = vsel %vm237_vm5, %v239_v52, %v235_v59  ;;  %v250_v62 = vsel %vm249_vm6, %v615_v35, %v246_v58 }
  0x60   : > { %v255_v63 = vsel %vm252_vm7, %v254_v56, %v250_v62  ;;  %v257_v0 = vmul.f32 %v909_v7, %v240_v61 }
  0x61   : > { %v617_v2 = vpop.eup %616  ;;  %v258_v3 = vmul.f32 %v911_v8, %v255_v63 }
  0x62   : > { %v285_v4 = vmul.f32 %v617_v2, %v257_v0  ;;  %v619_v9 = vpop.eup %618 }
  0x63   : > { %v286_v12 = vmul.f32 %v619_v9, %v258_v3  ;;  %v621_v21 = vpop.eup %620 }
  0x64   : > { %v297_v13 = vrot.slane %v285_v4, 4  ;;  %v345_v16 = vmul.f32 %v339_v5, %v285_v4  ;;  %v347_v17 = vmul.f32 %v341_v6, %v285_v4  ;;  %v349_v20 = vmul.f32 %v343_v11, %v285_v4  ;;  %v623_v27 = vpop.eup %622 }
  0x65   : > { %v303_v7 = vrot.slane %v286_v12, 4  ;;  %v346_v19 = vmul.f32 %v340_v10, %v286_v12  ;;  %v348_v23 = vmul.f32 %v342_v14, %v286_v12  ;;  %v350_v24 = vmul.f32 %v344_v15, %v286_v12 }
  0x66   : > { %v298_v18 = vadd.f32 %v297_v13, %v285_v4  ;;  %v351_v25 = vrot.slane %v345_v16, 4  ;;  %v363_v26 = vrot.slane %v347_v17, 4  ;;  %v375_v31 = vrot.slane %v349_v20, 4 }
  0x67   : > { %v304_v22 = vadd.f32 %v303_v7, %v286_v12  ;;  %v357_v30 = vrot.slane %v346_v19, 4  ;;  %v295_v32 = vmax.f32 %v621_v21, 1e-10  ;;  %v369_v35 = vrot.slane %v348_v23, 4 }
  0x68   : > { %v299_v8 = vrot.slane %v298_v18, 2  ;;  %v381_v36 = vrot.slane %v350_v24, 4  ;;  %v296_v37 = vmax.f32 %v623_v27, 1e-10  ;;  %v352_v38 = vadd.f32 %v351_v25, %v345_v16 }
  0x69   : > { %v305_v29 = vrot.slane %v304_v22, 2  ;;  %v364_v39 = vadd.f32 %v363_v26, %v347_v17  ;;  %v358_v42 = vadd.f32 %v357_v30, %v346_v19  ;;  %v376_v43 = vadd.f32 %v375_v31, %v349_v20 }
  0x6a   : > { %v300_v28 = vadd.f32 %v299_v8, %v298_v18  ;;  %v370_v46 = vadd.f32 %v369_v35, %v348_v23  ;;  %v382_v47 = vadd.f32 %v381_v36, %v350_v24  ;;  %v353_v48 = vrot.slane %v352_v38, 2 }
  0x6b   : > { %v306_v34 = vadd.f32 %v305_v29, %v304_v22  ;;  %v365_v49 = vrot.slane %v364_v39, 2  ;;  %v359_v51 = vrot.slane %v358_v42, 2  ;;  %v377_v52 = vrot.slane %v376_v43, 2 }
  0x6c   : > { %v301_v33 = vrot.slane %v300_v28, 1  ;;  %v371_v53 = vrot.slane %v370_v46, 2  ;;  %v383_v54 = vrot.slane %v382_v47, 2  ;;  %v354_v55 = vadd.f32 %v353_v48, %v352_v38 }
  0x6d   : > { %v307_v41 = vrot.slane %v306_v34, 1  ;;  %v366_v56 = vadd.f32 %v365_v49, %v364_v39  ;;  %v360_v57 = vadd.f32 %v359_v51, %v358_v42  ;;  %v378_v58 = vadd.f32 %v377_v52, %v376_v43 }
  0x6e   : > { %v302_v40 = vadd.f32 %v301_v33, %v300_v28  ;;  %v372_v60 = vadd.f32 %v371_v53, %v370_v46  ;;  %v384_v61 = vadd.f32 %v383_v54, %v382_v47  ;;  %v355_v63 = vrot.slane %v354_v55, 1 }
  0x6f   : > { %v308_v44 = vadd.f32 %v307_v41, %v306_v34  ;;  %v367_v0 = vrot.slane %v366_v56, 1  ;;  %v361_v3 = vrot.slane %v360_v57, 1  ;;  %v379_v4 = vrot.slane %v378_v58, 1 }
  0x70   : > { %v309_v45 = vadd.f32 %v302_v40, %v295_v32  ;;  %v373_v11 = vrot.slane %v372_v60, 1  ;;  %v385_v12 = vrot.slane %v384_v61, 1  ;;  %v356_v18 = vadd.f32 %v355_v63, %v354_v55 }
  0x71   : > { %v310_v50 = vadd.f32 %v308_v44, %v296_v37  ;;  %v368_v20 = vadd.f32 %v367_v0, %v366_v56  ;;  %v362_v8 = vadd.f32 %v361_v3, %v360_v57  ;;  %v380_v23 = vadd.f32 %v379_v4, %v378_v58 }
  0x72   : > { %624 = vrcp.f32 %v309_v45  ;;  %vm316_vm8 = vweird.f32 %v309_v45  ;;  %v322_v2 = vand.u32 2147483648, %v309_v45  ;;  %v320_v6 = vand.u32 2147483647, %v309_v45 }
  0x73   : > { %626 = vrcp.f32 %v310_v50  ;;  %vm330_vm10 = vweird.f32 %v310_v50  ;;  %v336_v10 = vand.u32 2147483648, %v310_v50  ;;  %v334_v15 = vand.u32 2147483647, %v310_v50 }
  0x74   : > { %v323_v17 = vor.u32 1.1754944e-38, %v322_v2  ;;  %vm321_vm13 = vcmp.eq.f32.partialorder %v320_v6, 8.507059e+37  ;;  %v374_v22 = vadd.f32 %v373_v11, %v372_v60  ;;  %v386_v26 = vadd.f32 %v385_v12, %v384_v61 }
  0x75   : > { %v337_v21 = vor.u32 1.1754944e-38, %v336_v10  ;;  %vm335_vm15 = vcmp.eq.f32.partialorder %v334_v15, 8.507059e+37 }
  0x78   : > { %v625_v59 = vpop.eup %624 }
  0x79   : > { %v312_v62 = vmul.f32 %v625_v59, %v309_v45  ;;  %v627_v1 = vpop.eup %626  ;;  %vm317_vm9 = vweird.f32 %v625_v59 }
  0x7a   : > { %v326_v9 = vmul.f32 %v627_v1, %v310_v50  ;;  %vm331_vm11 = vweird.f32 %v627_v1  ;;  %vm932_vm12 = vmor %vm316_vm8, %vm317_vm9 }
  0x7b   : > { %v313_v5 = vsub.f32 1.0, %v312_v62  ;;  %vm332_vm14 = vmor %vm330_vm10, %vm331_vm11 }
  0x7c   : > { %v327_v14 = vsub.f32 1.0, %v326_v9 }
  0x7d   : > { %v314_v13 = vmul.f32 %v625_v59, %v313_v5 }
  0x7e   : > { %v328_v19 = vmul.f32 %v627_v1, %v327_v14 }
  0x7f   : > { %v315_v7 = vadd.f32 %v625_v59, %v314_v13 }
  0x80   : > { %v329_v25 = vadd.f32 %v627_v1, %v328_v19 }
  0x81   : > { %v319_v24 = vsel %vm932_vm12, %v625_v59, %v315_v7 }
  0x82   : > { %v324_v27 = vsel %vm321_vm13, %v323_v17, %v319_v24  ;;  %v333_v28 = vsel %vm332_vm14, %v627_v1, %v329_v25 }
  0x83   : > { %v338_v29 = vsel %vm335_vm15, %v337_v21, %v333_v28  ;;  %v387_v30 = vmul.f32 %v356_v18, %v324_v27  ;;  %v389_v31 = vmul.f32 %v368_v20, %v324_v27  ;;  %v391_v34 = vmul.f32 %v380_v23, %v324_v27 }
  0x84   : > { %v388_v32 = vmul.f32 %v362_v8, %v338_v29  ;;  %v390_v33 = vmul.f32 %v374_v22, %v338_v29  ;;  %v392_v35 = vmul.f32 %v386_v26, %v338_v29 }
  0x86   : > { %v399_v36 = vrot.slane %v388_v32, 4  ;;  %v400_v37 = vrot.slane %v390_v33, 4  ;;  %v401_v38 = vrot.slane %v392_v35, 4 }
  0x88   : > { %v403_v39 = vsel %vm402_vm0, %v387_v30, %v399_v36  ;;  %v404_v40 = vsel %vm402_vm0, %v389_v31, %v400_v37  ;;  %v405_v41 = vsel %vm402_vm0, %v391_v34, %v401_v38 }
  0x89   : > { %v406_v42 = vrot.slane %v404_v40, 7  ;;  %v411_v43 = vrot.slane %v405_v41, 6 }
  0x8b   : > { %v408_v44 = vsel %vm407_vm1, %v406_v42, %v403_v39 }
  0x8c   : > { %v410_v45 = vsel %vm409_vm2, %v406_v42, %v408_v44 }
  0x8d   : > { %v413_v46 = vsel %vm412_vm3, %v411_v43, %v410_v45 }
  0x8e   : > { %v415_v47 = vsel %vm414_vm4, %v411_v43, %v413_v46 }
  0x8f   : > { %417 = vst [vmem:[%s205_s14] sm:$0x77] %v415_v47 }
  0x90   : > { %715 = shalt.err (!%p712_p7)
}
  0x91   : > { %558 = dma.vmem_to_hbm [thread:$0]  (%p824_p11), %s433_s13, 128, %s435_s16, %s419_s17  }
  0x92 PF: > { %s446_s22 = sand.u32 1, %s746_s9   ;;  %p568_p0 = pnand %p530_p9, %p828_p12 }
  0x93   : > { %s447_s6 = scalar_lea.sflag [#allocation4], %s446_s22 }
  0x94   : > { %p569_p8 = pneg %p568_p0 }
  0x96   : > { %741 = dma.done.wait (%p569_p8), %s447_s6, 128  }
  0x97   : > { %743 = vsyncadd (%p569_p8), %s447_s6, 4294967168  ;;  %p18_p10 = scmp.ge.s32.totalorder %s803_s15, 4   ;;  %s987_s9 = smov %s750_s10 }
  0x98   : > { %s988_s10 = smov %s754_s11  ;;  %s989_s11 = smov %s815_s18 }
  0x99   : > { %s990_s12 = smov %s803_s15  ;;  %20 = sbr.rel (!%p18_p10) target bundleno = 9 (0x9), region = 88 }
  0x9e   :  { %453 = vsyncpa [#allocation3], 1 }
  0x9f   :  { %455 = vsyncpa [#allocation3 + $0x1], 1 }
  0xa0   :  { %456 = vsyncpa [#allocation6], 1 }
  0xa1   :  { %458 = vsyncpa [#allocation6 + $0x1], 1 }
  0xa2   :  { %459 = vsyncpa [#allocation4], 1 }
  0xa3   :  { %461 = vsyncpa [#allocation4 + $0x1], 1 }

</bundles_post_ra>
